<compile_context>
chip_gen: v7x
topology: tpu7x:2x2x1
jax: 0.10.0
libtpu: 0.0.40
codegen_flags: <defaults>
</compile_context>

<pallas_src>
import functools

import jax
import jax.numpy as jnp
from jax import lax
from jax.experimental import pallas as pl
from jax.experimental.pallas import tpu as pltpu


def _deepset_kernel(x_ref, wa_ref, ba_ref, wc_ref, s_ref, r_ref, wb_ref,
                    bb_ref, o_ref, *, c_out, eps):
    """Transposed layout: channels on sublanes, (batch*set) positions on
    lanes.  Every array here is lane-dense (cols is a multiple of 128 or the
    full extent)."""
    xt = x_ref[...]                                            # (C_in, cols) f32

    # Fused first linear for both branches: sublane rows [0:mid) are branch 1,
    # rows [mid:2*mid) are branch 2.
    hp = jnp.dot(wa_ref[...], xt,
                 preferred_element_type=jnp.float32) + ba_ref[...]   # (2mid, cols)

    # Branch-2 set-mean centering, kept on the MXU (no segmented lane reduce):
    #   per-batch mean : X^T @ S           (C_in, TB)    S[b*N+s, b] = 1/N
    #   projection     : [0 | W2a]^T @ m   (2mid, TB)    zero rows for branch 1
    #   expand over set: corr @ R          (2mid, cols)  R[b, b*N+s] = 1
    m = jnp.dot(xt, s_ref[...], preferred_element_type=jnp.float32)
    corr = jnp.dot(wc_ref[...], m, preferred_element_type=jnp.float32)
    corr_e = jnp.dot(corr, r_ref[...], preferred_element_type=jnp.float32)

    h = jnp.maximum(hp - corr_e, 0.0)                          # ReLU, f32, dense lanes

    # Fused second linear (block-diagonal weight) + tanh (EUP slot).
    z = jnp.tanh(jnp.dot(wb_ref[...], h,
                         preferred_element_type=jnp.float32) + bb_ref[...])  # (2*C_out, cols)

    # Exact branch sum via aligned sublane slices (no extra MXU pass, no
    # truncation of the tanh outputs).
    y = z[:c_out, :] + z[c_out:, :]                            # (C_out, cols)

    # Per-position L2 normalization over channels: sublane reduce + rsqrt.
    # eps=0.0 matches the reference 1/sqrt exactly (an all-zero row would give
    # inf, same as the PyTorch module); pass a tiny eps for robustness.
    inv = lax.rsqrt(jnp.sum(y * y, axis=0, keepdims=True) + eps)
    o_ref[...] = (y * inv).astype(o_ref.dtype)


def _auto_num_blocks(B, N):
    """1 grid step by default (this problem is fixed-overhead bound); 2
    'parallel' steps on v7x so both of its TensorCores get a shard."""
    try:
        kind = jax.devices()[0].device_kind.lower()
    except Exception:
        kind = ""
    nb = 2 if ("v7" in kind or "7x" in kind) else 1
    if nb > 1 and (B % nb != 0 or ((B // nb) * N) % 128 != 0):
        nb = 1          # fall back to a single full-extent block
    return nb


def deepset_layer(x, params, *, num_blocks=None, eps=0.0):
    """x: (B, N, C_in) float32.  params: per-branch Conv1d(k=1) weights stored
    transposed as (in, out) plus (1, out) biases (see init_params)."""
    B, N, C_in = x.shape
    w1a, b1a, w1b, b1b = params["w1a"], params["b1a"], params["w1b"], params["b1b"]
    w2a, b2a, w2b, b2b = params["w2a"], params["b2a"], params["w2b"], params["b2b"]
    mid = w1a.shape[1]
    C_out = w1b.shape[1]

    # ---- branch fusion (transposed weights), done once outside the kernel --
    waT = jnp.concatenate([w1a.T, w2a.T], axis=0)                    # (2*mid, C_in)
    baT = jnp.concatenate([b1a, b2a], axis=1).T                      # (2*mid, 1)
    wcT = jnp.concatenate([jnp.zeros((mid, C_in), jnp.float32), w2a.T], axis=0)
    wbT = jnp.zeros((2 * C_out, 2 * mid), jnp.float32)
    wbT = wbT.at[:C_out, :mid].set(w1b.T).at[C_out:, mid:].set(w2b.T)
    bbT = jnp.concatenate([b1b, b2b], axis=1).T                      # (2*C_out, 1)

    if num_blocks is None:
        num_blocks = _auto_num_blocks(B, N)
    assert B % num_blocks == 0, "num_blocks must divide the batch"
    block_b = B // num_blocks
    cols = block_b * N

    # Per-block set-mean helpers (identical block-diagonal structure on every
    # grid step, so they get constant index maps and are never re-DMA'd).
    S = jnp.kron(jnp.eye(block_b, dtype=jnp.float32),
                 jnp.full((N, 1), 1.0 / N, jnp.float32))             # (cols, block_b)
    R = jnp.kron(jnp.eye(block_b, dtype=jnp.float32),
                 jnp.ones((1, N), jnp.float32))                      # (block_b, cols)

    # Lane-dense transposed input: (C_in, B*N).  Tiny wrapper-side relayout.
    xT = jnp.transpose(x, (2, 0, 1)).reshape(C_in, B * N)

    kernel = functools.partial(_deepset_kernel, c_out=C_out, eps=eps)

    def const_spec(arr):   # whole 2-D array, constant block index
        return pl.BlockSpec(arr.shape, lambda b: (0, 0))

    outT = pl.pallas_call(
        kernel,
        out_shape=jax.ShapeDtypeStruct((C_out, B * N), jnp.float32),
        grid_spec=pltpu.PrefetchScalarGridSpec(
            num_scalar_prefetch=0,
            grid=(num_blocks,),
            in_specs=[
                pl.BlockSpec((C_in, cols), lambda b: (0, b)),
                const_spec(waT), const_spec(baT), const_spec(wcT),
                const_spec(S), const_spec(R),
                const_spec(wbT), const_spec(bbT),
            ],
            out_specs=pl.BlockSpec((C_out, cols), lambda b: (0, b)),
        ),
        compiler_params=pltpu.CompilerParams(
            dimension_semantics=("parallel",)),
    )(xT, waT, baT, wcT, S, R, wbT, bbT)

    # Back to the module's (B, N, C_out) output layout.
    return outT.reshape(C_out, B, N).transpose(1, 2, 0)


def init_params(key, original_in_features, in_features, out_features):
    """Deterministic synthetic init.  Conv1d(k=1) weights (out, in, 1) stored
    transposed as (in, out) so the math reads x @ W."""
    c_in = original_in_features + in_features
    mid = int((original_in_features + in_features + out_features) / 2)
    ks = jax.random.split(key, 8)
    scale = 0.1
    return {
        "w1a": scale * jax.random.normal(ks[0], (c_in, mid), jnp.float32),
        "b1a": scale * jax.random.normal(ks[1], (1, mid), jnp.float32),
        "w1b": scale * jax.random.normal(ks[2], (mid, out_features), jnp.float32),
        "b1b": scale * jax.random.normal(ks[3], (1, out_features), jnp.float32),
        "w2a": scale * jax.random.normal(ks[4], (c_in, mid), jnp.float32),
        "b2a": scale * jax.random.normal(ks[5], (1, mid), jnp.float32),
        "w2b": scale * jax.random.normal(ks[6], (mid, out_features), jnp.float32),
        "b2b": scale * jax.random.normal(ks[7], (1, out_features), jnp.float32),
    }


def reference(x, p):
    """Pure-JAX reference mirroring the PyTorch forward (x in (B, N, C_in))."""
    def mlp(z, wa, ba, wb, bb):
        h = jnp.maximum(jnp.einsum("bnc,cm->bnm", z, wa) + ba, 0.0)
        return jnp.tanh(jnp.einsum("bnm,mo->bno", h, wb) + bb)
    y1 = mlp(x, p["w1a"], p["b1a"], p["w1b"], p["b1b"])
    xc = x - jnp.mean(x, axis=1, keepdims=True)
    y2 = mlp(xc, p["w2a"], p["b2a"], p["w2b"], p["b2b"])
    y = y1 + y2
    return y / jnp.sqrt(jnp.sum(y * y, axis=2, keepdims=True))


if __name__ == "__main__":
    key = jax.random.PRNGKey(0)
    k_x, k_p = jax.random.split(key)

    # Shapes consistent with the module: batch of 32 events, sets of N=16
    # elements, 8+8 input features -> mid=16 -> 16 output features.
    B, N = 32, 16
    original_in_features, in_features, out_features = 8, 8, 16
    C_in = original_in_features + in_features          # 16

    x = jax.random.normal(k_x, (B, N, C_in), jnp.float32)
    params = init_params(k_p, original_in_features, in_features, out_features)

    ref = reference(x, params)

    # Tolerance leaves headroom for the MXU's DEFAULT matmul precision
    # (bf16-class operand rounding) interacting with the algebraic
    # refactoring (branch fusion + matmul-based mean centering); any
    # structural bug would produce O(0.1..1) errors.  The branch sum itself
    # is now exact (sublane slice + add, no fold matmul).
    out = jax.block_until_ready(deepset_layer(x, params))
    assert out.shape == (B, N, out_features)
    assert jnp.allclose(out, ref, atol=2e-2, rtol=2e-2), "kernel mismatch"

    print("KERNEL_OK")
</pallas_src>

<mosaic_0001>
module attributes {stable_mosaic.version = 11 : i64} {
  func.func @_deepset_kernel(%arg0: i32, %arg1: memref<16x512xf32, #tpu.memory_space<vmem>>, %arg2: memref<32x16xf32, #tpu.memory_space<vmem>>, %arg3: memref<32x1xf32, #tpu.memory_space<vmem>>, %arg4: memref<32x16xf32, #tpu.memory_space<vmem>>, %arg5: memref<512x32xf32, #tpu.memory_space<vmem>>, %arg6: memref<32x512xf32, #tpu.memory_space<vmem>>, %arg7: memref<32x32xf32, #tpu.memory_space<vmem>>, %arg8: memref<32x1xf32, #tpu.memory_space<vmem>>, %arg9: memref<16x512xf32, #tpu.memory_space<vmem>>) attributes {dimension_semantics = [#tpu.dimension_semantics<parallel>], iteration_bounds = array<i64: 1>, scalar_prefetch = 0 : i64, scratch_operands = 0 : i64, tpu.core_type = #tpu.core_type<tc>, window_params = [{transform_indices = @transform_0, window_bounds = array<i64: 16, 512>}, {pipeline_mode = #tpu.pipeline_mode<synchronous>, transform_indices = @transform_1, window_bounds = array<i64: 32, 16>}, {pipeline_mode = #tpu.pipeline_mode<synchronous>, transform_indices = @transform_2, window_bounds = array<i64: 32, 1>}, {pipeline_mode = #tpu.pipeline_mode<synchronous>, transform_indices = @transform_3, window_bounds = array<i64: 32, 16>}, {pipeline_mode = #tpu.pipeline_mode<synchronous>, transform_indices = @transform_4, window_bounds = array<i64: 512, 32>}, {pipeline_mode = #tpu.pipeline_mode<synchronous>, transform_indices = @transform_5, window_bounds = array<i64: 32, 512>}, {pipeline_mode = #tpu.pipeline_mode<synchronous>, transform_indices = @transform_6, window_bounds = array<i64: 32, 32>}, {pipeline_mode = #tpu.pipeline_mode<synchronous>, transform_indices = @transform_7, window_bounds = array<i64: 32, 1>}, {transform_indices = @transform_8, window_bounds = array<i64: 16, 512>}]} {
    %c0 = arith.constant 0 : index
    %c0_0 = arith.constant 0 : index
    %0 = vector.load %arg1[%c0, %c0_0] : memref<16x512xf32, #tpu.memory_space<vmem>>, vector<16x512xf32>
    %c0_1 = arith.constant 0 : index
    %c0_2 = arith.constant 0 : index
    %1 = vector.load %arg2[%c0_1, %c0_2] : memref<32x16xf32, #tpu.memory_space<vmem>>, vector<32x16xf32>
    %cst = arith.constant dense<0.000000e+00> : vector<32x512xf32>
    %2 = tpu.matmul %1, %0, %cst {dimension_numbers = #tpu.dot_dimension_numbers<[1], [0], [0], [1], [0, 0, 1, 1], [], []>} : vector<32x16xf32>, vector<16x512xf32>, vector<32x512xf32> -> vector<32x512xf32>
    %c0_3 = arith.constant 0 : index
    %c0_4 = arith.constant 0 : index
    %3 = vector.load %arg3[%c0_3, %c0_4] : memref<32x1xf32, #tpu.memory_space<vmem>>, vector<32x1xf32>
    %4 = vector.broadcast %3 : vector<32x1xf32> to vector<32x512xf32>
    %5 = arith.addf %2, %4 : vector<32x512xf32>
    %c0_5 = arith.constant 0 : index
    %c0_6 = arith.constant 0 : index
    %6 = vector.load %arg5[%c0_5, %c0_6] : memref<512x32xf32, #tpu.memory_space<vmem>>, vector<512x32xf32>
    %cst_7 = arith.constant dense<0.000000e+00> : vector<16x32xf32>
    %7 = tpu.matmul %0, %6, %cst_7 {dimension_numbers = #tpu.dot_dimension_numbers<[1], [0], [0], [1], [0, 0, 1, 1], [], []>} : vector<16x512xf32>, vector<512x32xf32>, vector<16x32xf32> -> vector<16x32xf32>
    %c0_8 = arith.constant 0 : index
    %c0_9 = arith.constant 0 : index
    %8 = vector.load %arg4[%c0_8, %c0_9] : memref<32x16xf32, #tpu.memory_space<vmem>>, vector<32x16xf32>
    %cst_10 = arith.constant dense<0.000000e+00> : vector<32x32xf32>
    %9 = tpu.matmul %8, %7, %cst_10 {dimension_numbers = #tpu.dot_dimension_numbers<[1], [0], [0], [1], [0, 0, 1, 1], [], []>} : vector<32x16xf32>, vector<16x32xf32>, vector<32x32xf32> -> vector<32x32xf32>
    %c0_11 = arith.constant 0 : index
    %c0_12 = arith.constant 0 : index
    %10 = vector.load %arg6[%c0_11, %c0_12] : memref<32x512xf32, #tpu.memory_space<vmem>>, vector<32x512xf32>
    %cst_13 = arith.constant dense<0.000000e+00> : vector<32x512xf32>
    %11 = tpu.matmul %9, %10, %cst_13 {dimension_numbers = #tpu.dot_dimension_numbers<[1], [0], [0], [1], [0, 0, 1, 1], [], []>} : vector<32x32xf32>, vector<32x512xf32>, vector<32x512xf32> -> vector<32x512xf32>
    %12 = arith.subf %5, %11 : vector<32x512xf32>
    %cst_14 = arith.constant 0.000000e+00 : f32
    %13 = vector.broadcast %cst_14 : f32 to vector<32x512xf32>
    %14 = arith.maximumf %12, %13 : vector<32x512xf32>
    %c0_15 = arith.constant 0 : index
    %c0_16 = arith.constant 0 : index
    %15 = vector.load %arg7[%c0_15, %c0_16] : memref<32x32xf32, #tpu.memory_space<vmem>>, vector<32x32xf32>
    %cst_17 = arith.constant dense<0.000000e+00> : vector<32x512xf32>
    %16 = tpu.matmul %15, %14, %cst_17 {dimension_numbers = #tpu.dot_dimension_numbers<[1], [0], [0], [1], [0, 0, 1, 1], [], []>} : vector<32x32xf32>, vector<32x512xf32>, vector<32x512xf32> -> vector<32x512xf32>
    %c0_18 = arith.constant 0 : index
    %c0_19 = arith.constant 0 : index
    %17 = vector.load %arg8[%c0_18, %c0_19] : memref<32x1xf32, #tpu.memory_space<vmem>>, vector<32x1xf32>
    %18 = vector.broadcast %17 : vector<32x1xf32> to vector<32x512xf32>
    %19 = arith.addf %16, %18 : vector<32x512xf32>
    %20 = math.tanh %19 : vector<32x512xf32>
    %21 = vector.extract_strided_slice %20 {offsets = [0, 0], sizes = [16, 512], strides = [1, 1]} : vector<32x512xf32> to vector<16x512xf32>
    %22 = vector.extract_strided_slice %20 {offsets = [16, 0], sizes = [16, 512], strides = [1, 1]} : vector<32x512xf32> to vector<16x512xf32>
    %23 = arith.addf %21, %22 : vector<16x512xf32>
    %24 = arith.mulf %23, %23 : vector<16x512xf32>
    %cst_20 = arith.constant dense<0.000000e+00> : vector<512xf32>
    %25 = vector.multi_reduction <add>, %24, %cst_20 [0] : vector<16x512xf32> to vector<512xf32>
    %26 = vector.shape_cast %25 : vector<512xf32> to vector<1x512xf32>
    %cst_21 = arith.constant 0.000000e+00 : f32
    %27 = vector.broadcast %cst_21 : f32 to vector<1x512xf32>
    %28 = arith.addf %26, %27 : vector<1x512xf32>
    %29 = math.rsqrt %28 : vector<1x512xf32>
    %30 = vector.broadcast %29 : vector<1x512xf32> to vector<16x512xf32>
    %31 = arith.mulf %23, %30 : vector<16x512xf32>
    %c0_22 = arith.constant 0 : index
    %c0_23 = arith.constant 0 : index
    %32 = vector.load %arg9[%c0_22, %c0_23] : memref<16x512xf32, #tpu.memory_space<vmem>>, vector<16x512xf32>
    tpu.vector_store %arg9[%c0_22, %c0_23], %31 {strides = array<i32>} : memref<16x512xf32, #tpu.memory_space<vmem>>, vector<16x512xf32>,
    return
  }
  func.func @transform_0(%arg0: i32) -> (i32, i32) {
    %c0_i32 = arith.constant 0 : i32
    %c0_i32_0 = arith.constant 0 : i32
    return %c0_i32, %arg0 : i32, i32
  }
  func.func @transform_1(%arg0: i32) -> (i32, i32) {
    %c0_i32 = arith.constant 0 : i32
    %c0_i32_0 = arith.constant 0 : i32
    %c0_i32_1 = arith.constant 0 : i32
    return %c0_i32, %c0_i32_0 : i32, i32
  }
  func.func @transform_2(%arg0: i32) -> (i32, i32) {
    %c0_i32 = arith.constant 0 : i32
    %c0_i32_0 = arith.constant 0 : i32
    %c0_i32_1 = arith.constant 0 : i32
    return %c0_i32, %c0_i32_0 : i32, i32
  }
  func.func @transform_3(%arg0: i32) -> (i32, i32) {
    %c0_i32 = arith.constant 0 : i32
    %c0_i32_0 = arith.constant 0 : i32
    %c0_i32_1 = arith.constant 0 : i32
    return %c0_i32, %c0_i32_0 : i32, i32
  }
  func.func @transform_4(%arg0: i32) -> (i32, i32) {
    %c0_i32 = arith.constant 0 : i32
    %c0_i32_0 = arith.constant 0 : i32
    %c0_i32_1 = arith.constant 0 : i32
    return %c0_i32, %c0_i32_0 : i32, i32
  }
  func.func @transform_5(%arg0: i32) -> (i32, i32) {
    %c0_i32 = arith.constant 0 : i32
    %c0_i32_0 = arith.constant 0 : i32
    %c0_i32_1 = arith.constant 0 : i32
    return %c0_i32, %c0_i32_0 : i32, i32
  }
  func.func @transform_6(%arg0: i32) -> (i32, i32) {
    %c0_i32 = arith.constant 0 : i32
    %c0_i32_0 = arith.constant 0 : i32
    %c0_i32_1 = arith.constant 0 : i32
    return %c0_i32, %c0_i32_0 : i32, i32
  }
  func.func @transform_7(%arg0: i32) -> (i32, i32) {
    %c0_i32 = arith.constant 0 : i32
    %c0_i32_0 = arith.constant 0 : i32
    %c0_i32_1 = arith.constant 0 : i32
    return %c0_i32, %c0_i32_0 : i32, i32
  }
  func.func @transform_8(%arg0: i32) -> (i32, i32) {
    %c0_i32 = arith.constant 0 : i32
    %c0_i32_0 = arith.constant 0 : i32
    return %c0_i32, %arg0 : i32, i32
  }
}

</mosaic_0001>

<bundles_post_ra>
// kernel: tpu_custom_call.1
= control target key start
LH: loop header
LB: loop body
LE: loop exit
PB: predicated region body
PF: predicated region fallthrough
CT: control target
= control target key end

     0   :  { %v1432_v7 = vmov 0.0   ;;  %v1433_v13 = vmov 0   ;;  %vm66_vm0 = vcmask 130048   ;;  %s1960_s0 = inlined_call_operand.vmem [shape: f32[16,512], index: 0, kind: input, shape index: {}]   ;;  %s1961_s1 = inlined_call_operand.vmem [shape: f32[32,16], index: 1, kind: input, shape index: {}]   ;;  %s1962_s2 = inlined_call_operand.vmem [shape: f32[32,1], index: 2, kind: input, shape index: {}]   ;;  %s1963_s3 = inlined_call_operand.vmem [shape: f32[32,16], index: 3, kind: input, shape index: {}]   ;;  %s1964_s4 = inlined_call_operand.vmem [shape: f32[512,32], index: 4, kind: input, shape index: {}]   ;;  %s1965_s5 = inlined_call_operand.vmem [shape: f32[32,512], index: 5, kind: input, shape index: {}]   ;;  %s1966_s6 = inlined_call_operand.vmem [shape: f32[32,32], index: 6, kind: input, shape index: {}]   ;;  %s1967_s7 = inlined_call_operand.vmem [shape: f32[32,1], index: 7, kind: input, shape index: {}]   ;;  %s1968_s8 = inlined_call_operand.hbm [shape: f32[16,512], index: 8, kind: output, shape index: {}]  }
   0x1   :  { %v1485_v0 = vld [vmem:[%s1960_s0 + $0x8] sm:$0xff]  ;;  %v1495_v2 = vld [vmem:[%s1960_s0 + $0x18] sm:$0xff]  ;;  %v1507_v5 = vld [vmem:[%s1960_s0] sm:$0xff]  ;;  %143 = vmatprep.mubr.f32.mxu0 %v1432_v7  ;;  %232 = vmatprep.mubr.f32.mxu1 %v1432_v7 }
   0x2   :  { %v1490_v1 = vld [vmem:[%s1960_s0 + $0x28] sm:$0xff]  ;;  %v1502_v4 = vld [vmem:[%s1960_s0 + $0x38] sm:$0xff]  ;;  %v1512_v6 = vld [vmem:[%s1960_s0 + $0x20] sm:$0xff]  ;;  %1366 = vset.pattern.permute.xlu0 %v1433_v13  ;;  %1367 = vset.pattern.permute.xlu1 %v1433_v13 }
   0x3   :  { %v1249_v3 = vpack.c.bf16 %v1490_v1, %v1485_v0  ;;  %v1253_v8 = vpack.c.bf16 %v1502_v4, %v1495_v2  ;;  %v1251_v9 = vpack.c.bf16 %v1512_v6, %v1507_v5  ;;  %v1523_v10 = vld [vmem:[%s1960_s0 + $0x10] sm:$0xff]  ;;  %v38_v12 = vld [vmem:[%s1961_s1] sm:$0xff]  ;;  %v274_v16 = vld [vmem:[%s1964_s4 + $0x88] sm:$0xff] }
   0x4   :  { %v1528_v11 = vld [vmem:[%s1960_s0 + $0x30] sm:$0xff]  ;;  %v273_v15 = vld [vmem:[%s1964_s4 + $0x80] sm:$0xff]  ;;  %v306_v19 = vld [vmem:[%s1964_s4 + $0x188] sm:$0xff] }
   0x5   :  { %1250 = vmatprep.subr.bf16.mxu0 %v1249_v3  ;;  %v1255_v14 = vpack.c.bf16 %v1528_v11, %v1523_v10  ;;  %v305_v17 = vld [vmem:[%s1964_s4 + $0x180] sm:$0xff]  ;;  %1254 = vmatprep.subr.bf16.mxu1 %v1253_v8  ;;  %v1257_v18 = vpack.c.bf16 %v274_v16, %v273_v15  ;;  %v258_v21 = vld [vmem:[%s1964_s4 + $0x8] sm:$0xff]  ;;  %v275_v26 = vld [vmem:[%s1964_s4 + $0x90] sm:$0xff] }
   0x6   :  { %1252 = vmatpush1.bf16.msra.mxu0 %v1251_v9  ;;  %v257_v20 = vld [vmem:[%s1964_s4] sm:$0xff]  ;;  %v1289_v22 = vpack.c.bf16 %v306_v19, %v305_v17  ;;  %v290_v25 = vld [vmem:[%s1964_s4 + $0x108] sm:$0xff]  ;;  %v276_v28 = vld [vmem:[%s1964_s4 + $0x98] sm:$0xff] }
   0x7   :  { %1256 = vmatpush1.bf16.msra.mxu1 %v1255_v14  ;;  %v1259_v23 = vpack.c.bf16 %v258_v21, %v257_v20  ;;  %v289_v24 = vld [vmem:[%s1964_s4 + $0x100] sm:$0xff]  ;;  %1258 = vmatprep.subr.bf16.mxu0 %v1257_v18  ;;  %v307_v29 = vld [vmem:[%s1964_s4 + $0x190] sm:$0xff]  ;;  %v308_v30 = vld [vmem:[%s1964_s4 + $0x198] sm:$0xff]  ;;  %v1261_v31 = vpack.c.bf16 %v276_v28, %v275_v26 }
   0x8   :  { %v1291_v27 = vpack.c.bf16 %v290_v25, %v289_v24  ;;  %1290 = vmatprep.subr.bf16.mxu1 %v1289_v22  ;;  %v1293_v32 = vpack.c.bf16 %v308_v30, %v307_v29  ;;  %v259_v33 = vld [vmem:[%s1964_s4 + $0x10] sm:$0xff]  ;;  %v260_v34 = vld [vmem:[%s1964_s4 + $0x18] sm:$0xff]  ;;  %v277_v38 = vld [vmem:[%s1964_s4 + $0xa0] sm:$0xff] }
   0x9   :  { %1129 = vmatmul.mubr.msk.f32.vlgmr.msra.gmra.mrb[0].mxu0 %vm66_vm0, %v38_v12  ;;  %v291_v35 = vld [vmem:[%s1964_s4 + $0x110] sm:$0xff]  ;;  %v1263_v36 = vpack.c.bf16 %v260_v34, %v259_v33  ;;  %v292_v37 = vld [vmem:[%s1964_s4 + $0x118] sm:$0xff]  ;;  %v278_v39 = vld [vmem:[%s1964_s4 + $0xa8] sm:$0xff] }
   0xa   :  { %1133 = vmatmul.mubr.msk.f32.vlgmr.msra.gmra.mrb[0].mxu1 %vm66_vm0, %v38_v12  ;;  %1260 = vmatpush3.bf16.msra.mxu0 %v1259_v23  ;;  %v1295_v40 = vpack.c.bf16 %v292_v37, %v291_v35  ;;  %v1265_v41 = vpack.c.bf16 %v278_v39, %v277_v38  ;;  %v309_v42 = vld [vmem:[%s1964_s4 + $0x1a0] sm:$0xff]  ;;  %v310_v43 = vld [vmem:[%s1964_s4 + $0x1a8] sm:$0xff]  ;;  %v279_v49 = vld [vmem:[%s1964_s4 + $0xb0] sm:$0xff] }
   0xb   :  { %1292 = vmatpush3.bf16.msra.mxu1 %v1291_v27  ;;  %1262 = vmatprep.subr.bf16.mxu0 %v1261_v31  ;;  %v261_v44 = vld [vmem:[%s1964_s4 + $0x20] sm:$0xff]  ;;  %v1297_v45 = vpack.c.bf16 %v310_v43, %v309_v42  ;;  %v262_v46 = vld [vmem:[%s1964_s4 + $0x28] sm:$0xff]  ;;  %v280_v50 = vld [vmem:[%s1964_s4 + $0xb8] sm:$0xff] }
   0xc   :  { %1294 = vmatprep.subr.bf16.mxu1 %v1293_v32  ;;  %v293_v47 = vld [vmem:[%s1964_s4 + $0x120] sm:$0xff]  ;;  %v294_v48 = vld [vmem:[%s1964_s4 + $0x128] sm:$0xff]  ;;  %149 = vmatprep.mubr.f32.mxu0 %v1432_v7  ;;  %v311_v51 = vld [vmem:[%s1964_s4 + $0x1b0] sm:$0xff]  ;;  %v1267_v52 = vpack.c.bf16 %v262_v46, %v261_v44  ;;  %v1269_v55 = vpack.c.bf16 %v280_v50, %v279_v49 }
   0xd   :  { %238 = vmatprep.mubr.f32.mxu1 %v1432_v7  ;;  %v312_v53 = vld [vmem:[%s1964_s4 + $0x1b8] sm:$0xff]  ;;  %v1299_v54 = vpack.c.bf16 %v294_v48, %v293_v47  ;;  %v263_v56 = vld [vmem:[%s1964_s4 + $0x30] sm:$0xff]  ;;  %v281_v61 = vld [vmem:[%s1964_s4 + $0xc0] sm:$0xff] }
   0xe   :  { %1264 = vmatpush3.bf16.msra.mxu0 %v1263_v36  ;;  %v264_v57 = vld [vmem:[%s1964_s4 + $0x38] sm:$0xff]  ;;  %v295_v58 = vld [vmem:[%s1964_s4 + $0x130] sm:$0xff]  ;;  %v1301_v59 = vpack.c.bf16 %v312_v53, %v311_v51  ;;  %v282_v62 = vld [vmem:[%s1964_s4 + $0xc8] sm:$0xff] }
   0xf   :  { %1296 = vmatpush3.bf16.msra.mxu1 %v1295_v40  ;;  %1266 = vmatprep.subr.bf16.mxu0 %v1265_v41  ;;  %v296_v60 = vld [vmem:[%s1964_s4 + $0x138] sm:$0xff]  ;;  %v313_v63 = vld [vmem:[%s1964_s4 + $0x1c0] sm:$0xff]  ;;  %v314_v3 = vld [vmem:[%s1964_s4 + $0x1c8] sm:$0xff]  ;;  %v1271_v8 = vpack.c.bf16 %v264_v57, %v263_v56  ;;  %v1273_v13 = vpack.c.bf16 %v282_v62, %v281_v61 }
  0x10   :  { %1298 = vmatprep.subr.bf16.mxu1 %v1297_v45  ;;  %v39_v9 = vld [vmem:[%s1961_s1 + $0x8] sm:$0xff]  ;;  %v1303_v12 = vpack.c.bf16 %v296_v60, %v295_v58  ;;  %v265_v14 = vld [vmem:[%s1964_s4 + $0x40] sm:$0xff]  ;;  %v1305_v17 = vpack.c.bf16 %v314_v3, %v313_v63  ;;  %v283_v19 = vld [vmem:[%s1964_s4 + $0xd0] sm:$0xff] }
  0x11   :  { %v266_v15 = vld [vmem:[%s1964_s4 + $0x48] sm:$0xff]  ;;  %v297_v16 = vld [vmem:[%s1964_s4 + $0x140] sm:$0xff]  ;;  %1130 = vmatmul.mubr.msk.f32.gmra.mrb[2].mxu0 %vm66_vm0, %v39_v9  ;;  %v284_v20 = vld [vmem:[%s1964_s4 + $0xd8] sm:$0xff]  ;;  %1134 = vmatmul.mubr.msk.f32.gmra.mrb[2].mxu1 %vm66_vm0, %v39_v9 }
  0x12   :  { %1268 = vmatpush3.bf16.msra.mxu0 %v1267_v52  ;;  %v298_v18 = vld [vmem:[%s1964_s4 + $0x148] sm:$0xff]  ;;  %v315_v21 = vld [vmem:[%s1964_s4 + $0x1d0] sm:$0xff]  ;;  %v316_v22 = vld [vmem:[%s1964_s4 + $0x1d8] sm:$0xff]  ;;  %155 = vmatprep.mubr.f32.mxu0 %v1432_v7  ;;  %v1275_v24 = vpack.c.bf16 %v266_v15, %v265_v14  ;;  %v1277_v26 = vpack.c.bf16 %v284_v20, %v283_v19 }
  0x13   :  { %1300 = vmatpush3.bf16.msra.mxu1 %v1299_v54  ;;  %1270 = vmatprep.subr.bf16.mxu0 %v1269_v55  ;;  %v40_v23 = vld [vmem:[%s1961_s1 + $0x10] sm:$0xff]  ;;  %v1307_v25 = vpack.c.bf16 %v298_v18, %v297_v16  ;;  %v268_v28 = vld [vmem:[%s1964_s4 + $0x58] sm:$0xff]  ;;  %v1309_v30 = vpack.c.bf16 %v316_v22, %v315_v21  ;;  %v285_v32 = vld [vmem:[%s1964_s4 + $0xe0] sm:$0xff] }
  0x14   :  { %1302 = vmatprep.subr.bf16.mxu1 %v1301_v59  ;;  %244 = vmatprep.mubr.f32.mxu1 %v1432_v7  ;;  %v267_v27 = vld [vmem:[%s1964_s4 + $0x50] sm:$0xff]  ;;  %v300_v31 = vld [vmem:[%s1964_s4 + $0x158] sm:$0xff]  ;;  %v286_v33 = vld [vmem:[%s1964_s4 + $0xe8] sm:$0xff] }
  0x15   :  { %v299_v29 = vld [vmem:[%s1964_s4 + $0x150] sm:$0xff]  ;;  %1131 = vmatmul.mubr.msk.f32.gmra.mrb[4].mxu0 %vm66_vm0, %v40_v23  ;;  %1135 = vmatmul.mubr.msk.f32.gmra.mrb[4].mxu1 %vm66_vm0, %v40_v23  ;;  %v317_v34 = vld [vmem:[%s1964_s4 + $0x1e0] sm:$0xff]  ;;  %v318_v35 = vld [vmem:[%s1964_s4 + $0x1e8] sm:$0xff]  ;;  %v1279_v37 = vpack.c.bf16 %v268_v28, %v267_v27  ;;  %v1281_v40 = vpack.c.bf16 %v286_v33, %v285_v32 }
  0x16   :  { %1272 = vmatpush3.bf16.msra.mxu0 %v1271_v8  ;;  %161 = vmatprep.mubr.f32.mxu0 %v1432_v7  ;;  %v41_v36 = vld [vmem:[%s1961_s1 + $0x18] sm:$0xff]  ;;  %v269_v38 = vld [vmem:[%s1964_s4 + $0x60] sm:$0xff]  ;;  %v1311_v39 = vpack.c.bf16 %v300_v31, %v299_v29  ;;  %v270_v41 = vld [vmem:[%s1964_s4 + $0x68] sm:$0xff]  ;;  %v1313_v44 = vpack.c.bf16 %v318_v35, %v317_v34 }
  0x17   :  { %1304 = vmatpush3.bf16.msra.mxu1 %v1303_v12  ;;  %1274 = vmatprep.subr.bf16.mxu0 %v1273_v13  ;;  %v301_v42 = vld [vmem:[%s1964_s4 + $0x160] sm:$0xff]  ;;  %v302_v43 = vld [vmem:[%s1964_s4 + $0x168] sm:$0xff]  ;;  %v287_v45 = vld [vmem:[%s1964_s4 + $0xf0] sm:$0xff] }
  0x18   :  { %1306 = vmatprep.subr.bf16.mxu1 %v1305_v17  ;;  %250 = vmatprep.mubr.f32.mxu1 %v1432_v7  ;;  %v288_v46 = vld [vmem:[%s1964_s4 + $0xf8] sm:$0xff] }
  0x19   :  { %1132 = vmatmul.mubr.msk.f32.gmra.mrb[6].mxu0 %vm66_vm0, %v41_v36 }
  0x1a   :  { %1276 = vmatpush3.bf16.msra.mxu0 %v1275_v24 }
  0x1b   :  { %1308 = vmatpush3.bf16.msra.mxu1 %v1307_v25  ;;  %1278 = vmatprep.subr.bf16.mxu0 %v1277_v26 }
  0x1c   :  { %1310 = vmatprep.subr.bf16.mxu1 %v1309_v30 }
  0x1d   :  { %13 = vsyncpa [#allocation3], 0  ;;  %1136 = vmatmul.mubr.msk.f32.gmra.mrb[6].mxu1 %vm66_vm0, %v41_v36  ;;  %v319_v47 = vld [vmem:[%s1964_s4 + $0x1f0] sm:$0xff]  ;;  %v320_v48 = vld [vmem:[%s1964_s4 + $0x1f8] sm:$0xff]  ;;  %385 = vmatprep.mubr.f32.mxu0 %v1485_v0  ;;  %v1283_v50 = vpack.c.bf16 %v270_v41, %v269_v38  ;;  %v1315_v52 = vpack.c.bf16 %v302_v43, %v301_v42  ;;  %v1285_v53 = vpack.c.bf16 %v288_v46, %v287_v45  ;;  %vm588_vm1 = vcmask 261120  }
  0x1e   :  { %v42_v49 = vld [vmem:[%s1962_s2] sm:$0xff]  ;;  %1280 = vmatpush3.bf16.msra.mxu0 %v1279_v37  ;;  %460 = vmatprep.mubr.f32.mxu1 %v1495_v2  ;;  %v44_v51 = vld [vmem:[%s1962_s2 + $0x10] sm:$0xff]  ;;  %v272_v54 = vld [vmem:[%s1964_s4 + $0x78] sm:$0xff]  ;;  %v1317_v55 = vpack.c.bf16 %v320_v48, %v319_v47 }
  0x1f   :  { %1312 = vmatpush3.bf16.msra.mxu1 %v1311_v39  ;;  %1282 = vmatprep.subr.bf16.mxu0 %v1281_v40  ;;  %v271_v0 = vld [vmem:[%s1964_s4 + $0x70] sm:$0xff]  ;;  %v304_v56 = vld [vmem:[%s1964_s4 + $0x178] sm:$0xff]  ;;  %v43_v57 = vld [vmem:[%s1962_s2 + $0x8] sm:$0xff] }
  0x20   :  { %1314 = vmatprep.subr.bf16.mxu1 %v1313_v44  ;;  %v303_v2 = vld [vmem:[%s1964_s4 + $0x170] sm:$0xff]  ;;  %48 = vperm.xlu0 %1366, %v42_v49   ;;  %v1287_v58 = vpack.c.bf16 %v272_v54, %v271_v0  ;;  %v45_v59 = vld [vmem:[%s1962_s2 + $0x18] sm:$0xff]  ;;  %v471_v61 = vld [vmem:[%s1963_s3] sm:$0xff] }
  0x21   :  { %58 = vperm.xlu1 %1367, %v44_v51   ;;  %v1319_v60 = vpack.c.bf16 %v304_v56, %v303_v2  ;;  %v581_v62 = vld [vmem:[%s1965_s5 + $0x48] sm:$0xff]  ;;  %v580_v8 = vld [vmem:[%s1965_s5 + $0x40] sm:$0xff]  ;;  %v575_v42 = vld [vmem:[%s1965_s5 + $0x18] sm:$0xff] }
  0x22   :  { %1284 = vmatpush3.bf16.msra.mxu0 %v1283_v50  ;;  %v585_v63 = vld [vmem:[%s1965_s5 + $0x68] sm:$0xff]  ;;  %v584_v9 = vld [vmem:[%s1965_s5 + $0x60] sm:$0xff]  ;;  %v579_v43 = vld [vmem:[%s1965_s5 + $0x38] sm:$0xff] }
  0x23   :  { %1316 = vmatpush3.bf16.msra.mxu1 %v1315_v52  ;;  %1286 = vmatprep.subr.bf16.mxu0 %v1285_v53  ;;  %v1329_v3 = vpack.c.bf16 %v585_v63, %v581_v62  ;;  %v1331_v12 = vpack.c.bf16 %v584_v9, %v580_v8  ;;  %v1333_v46 = vpack.c.bf16 %v579_v43, %v575_v42  ;;  %v574_v47 = vld [vmem:[%s1965_s5 + $0x10] sm:$0xff]  ;;  %v583_v49 = vld [vmem:[%s1965_s5 + $0x58] sm:$0xff]  ;;  %v472_v51 = vld [vmem:[%s1963_s3 + $0x8] sm:$0xff] }
  0x24   :  { %1318 = vmatprep.subr.bf16.mxu1 %v1317_v55  ;;  %53 = vperm.xlu0 %1366, %v43_v57   ;;  %v578_v48 = vld [vmem:[%s1965_s5 + $0x30] sm:$0xff]  ;;  %v587_v50 = vld [vmem:[%s1965_s5 + $0x78] sm:$0xff]  ;;  %v815_v57 = vld [vmem:[%s1967_s7] sm:$0xff] }
  0x25   :  { %63 = vperm.xlu1 %1367, %v45_v59   ;;  %v1335_v52 = vpack.c.bf16 %v578_v48, %v574_v47  ;;  %v473_v53 = vld [vmem:[%s1963_s3 + $0x10] sm:$0xff]  ;;  %v1337_v0 = vpack.c.bf16 %v587_v50, %v583_v49  ;;  %v474_v2 = vld [vmem:[%s1963_s3 + $0x18] sm:$0xff] }
  0x26   :  { %1288 = vmatpush3.bf16.msra.mxu0 %v1287_v58  ;;  %v582_v54 = vld [vmem:[%s1965_s5 + $0x50] sm:$0xff]  ;;  %v816_v58 = vld [vmem:[%s1967_s7 + $0x8] sm:$0xff] }
  0x27   :  { %1320 = vmatpush3.bf16.msra.mxu1 %v1319_v60  ;;  %v586_v55 = vld [vmem:[%s1965_s5 + $0x70] sm:$0xff]  ;;  %v818_v60 = vld [vmem:[%s1967_s7 + $0x18] sm:$0xff] }
  0x28   :  { %v1339_v56 = vpack.c.bf16 %v586_v55, %v582_v54  ;;  %821 = vperm.xlu0 %1366, %v815_v57   ;;  %v817_v59 = vld [vmem:[%s1967_s7 + $0x10] sm:$0xff] }
  0x29   :  { %386 = vmatmul.mubr.f32.vlgmr.msra.gmra.mrb[8].mxu0 %v1507_v5  ;;  %v573_v5 = vld [vmem:[%s1965_s5 + $0x8] sm:$0xff]  ;;  %826 = vperm.xlu1 %1367, %v816_v58  }
  0x2a   :  { %461 = vmatmul.mubr.f32.vlgmr.msra.gmra.mrb[8].mxu1 %v1523_v10  ;;  %390 = vmatprep.mubr.f32.mxu0 %v1490_v1  ;;  %v577_v1 = vld [vmem:[%s1965_s5 + $0x28] sm:$0xff]  ;;  %v576_v10 = vld [vmem:[%s1965_s5 + $0x20] sm:$0xff] }
  0x2b   :  { %465 = vmatprep.mubr.f32.mxu1 %v1502_v4  ;;  %v1325_v4 = vpack.c.bf16 %v577_v1, %v573_v5 }
  0x2c   :  { %831 = vperm.xlu0 %1366, %v817_v59  }
  0x2d   :  { %391 = vmatmul.mubr.f32.gmra.mrb[10].mxu0 %v1512_v6  ;;  %v572_v6 = vld [vmem:[%s1965_s5] sm:$0xff]  ;;  %1326 = vmatprep.subr.bf16.mxu1 %v1325_v4 }
  0x2e   :  { %466 = vmatmul.mubr.f32.gmra.mrb[10].mxu1 %v1528_v11  ;;  %1243 = vmatprep.mubr.msk.f32.mxu0 %vm66_vm0, %v471_v61  ;;  %v1327_v11 = vpack.c.bf16 %v576_v10, %v572_v6 }
  0x2f   :  { %665 = vmatprep.mubr.f32.mxu1 %v1432_v7  ;;  %836 = vperm.xlu1 %1367, %v818_v60  }
  0x30   :  { %1328 = vmatpush1.bf16.msra.mxu1 %v1327_v11 }
  0x31   :  { %1330 = vmatprep.subr.bf16.mxu1 %v1329_v3 }
  0x34   :  { %1332 = vmatpush1.bf16.msra.mxu1 %v1331_v12 }
  0x9f   :  { %v49_v6 = vpop.permute.xlu0 %48 }
  0xa0   :  { %v59_v11 = vpop.permute.xlu1 %58 }
  0xa3   :  { %v54_v10 = vpop.permute.xlu0 %53 }
  0xdc   :  { %v1799_v13 = vpop.f32.mrb[0].mxu0 }
  0xdd   :  { %v1801_v14 = vpop.f32.mrb[0].mxu1  ;;  %v1803_v15 = vpop.f32.mrb[1].mxu0  ;;  %v146_v62 = vadd.f32 %v1799_v13, %v49_v6 }
  0xde   :  { %v1805_v16 = vpop.f32.mrb[1].mxu1  ;;  %v235_v63 = vadd.f32 %v1801_v14, %v49_v6  ;;  %v148_v3 = vadd.f32 %v1803_v15, %v49_v6 }
  0xdf   :  { %v237_v8 = vadd.f32 %v1805_v16, %v49_v6 }
  0xe4   :  { %v1807_v17 = vpop.f32.mrb[2].mxu0  ;;  %v1809_v18 = vpop.f32.mrb[2].mxu1 }
  0xe5   :  { %v1811_v19 = vpop.f32.mrb[3].mxu0  ;;  %v1813_v20 = vpop.f32.mrb[3].mxu1 }
  0xe6   :  { %v154_v13 = vadd.f32 %v1811_v19, %v54_v10  ;;  %v243_v14 = vadd.f32 %v1813_v20, %v54_v10 }
  0xe8   :  { %v1815_v21 = vpop.f32.mrb[4].mxu0  ;;  %v1817_v22 = vpop.f32.mrb[4].mxu1 }
  0xe9   :  { %v1819_v23 = vpop.f32.mrb[5].mxu0  ;;  %v1821_v24 = vpop.f32.mrb[5].mxu1  ;;  %v158_v42 = vadd.f32 %v1815_v21, %v59_v11 }
  0xea   :  { %v160_v16 = vadd.f32 %v1819_v23, %v59_v11  ;;  %v249_v43 = vadd.f32 %v1821_v24, %v59_v11 }
  0xec   :  { %v1823_v25 = vpop.f32.mrb[6].mxu0 }
  0xed   :  { %v1827_v27 = vpop.f32.mrb[7].mxu0 }
  0xf0   :  { %v1825_v26 = vpop.f32.mrb[6].mxu1 }
  0xf1   :  { %v1829_v28 = vpop.f32.mrb[7].mxu1 }
  0xfc   :  { %v1189_v29 = vpop.f32.mrb[8].mxu0 }
  0xfd   :  { %v1227_v30 = vpop.f32.mrb[8].mxu1  ;;  %v1190_v31 = vpop.f32.mrb[9].mxu0 }
  0xfe   :  { %v1191_v32 = vadd.f32 %v1190_v31, %v1189_v29  ;;  %v1228_v33 = vpop.f32.mrb[9].mxu1 }
  0xff   :  { %v1229_v34 = vadd.f32 %v1228_v33, %v1227_v30 }
 0x100   :  { %v1192_v35 = vpop.f32.mrb[10].mxu0 }
 0x101   :  { %v463_v36 = vadd.f32 %v1229_v34, %v1191_v32  ;;  %v1230_v37 = vpop.f32.mrb[10].mxu1  ;;  %v1193_v38 = vpop.f32.mrb[11].mxu0 }
 0x102   :  { %v1194_v39 = vadd.f32 %v1193_v38, %v1192_v35  ;;  %v1231_v40 = vpop.f32.mrb[11].mxu1  ;;  %v152_v35 = vadd.f32 %v1807_v17, %v54_v10 }
 0x103   :  { %v1232_v41 = vadd.f32 %v1231_v40, %v1230_v37 }
 0x105   :  { %v468_v44 = vadd.f32 %v1232_v41, %v1194_v39 }
 0x107   :  { %v1321_v45 = vpack.c.bf16 %v468_v44, %v463_v36  ;;  %v241_v36 = vadd.f32 %v1809_v18, %v54_v10  ;;  %v247_v18 = vadd.f32 %v1817_v22, %v59_v11 }
 0x109   :  { %1322 = vmatprep.subr.bf16.mxu0 %v1321_v45 }
 0x10a   :  { %1324 = vmatpush3.bf16.msra.mxu0 %v1321_v45  ;;  %v64_v45 = vpop.permute.xlu1 %63 }
 0x10b   :  { %1334 = vmatprep.subr.bf16.mxu0 %v1333_v46  ;;  %v164_v58 = vadd.f32 %v1823_v25, %v64_v45  ;;  %v253_v59 = vadd.f32 %v1825_v26, %v64_v45  ;;  %v166_v60 = vadd.f32 %v1827_v27, %v64_v45 }
 0x10d   :  { %1244 = vmatmul.mubr.msk.f32.vlgmr.msra.gmra.mrb[12].mxu0 %vm66_vm0, %v472_v51 }
 0x10e   :  { %1246 = vmatprep.mubr.msk.f32.mxu0 %vm66_vm0, %v473_v53  ;;  %1336 = vmatpush1.bf16.msra.mxu0 %v1335_v52 }
 0x10f   :  { %1338 = vmatprep.subr.bf16.mxu0 %v1337_v0 }
 0x111   :  { %1247 = vmatmul.mubr.msk.f32.gmra.mrb[14].mxu0 %vm66_vm0, %v474_v2 }
 0x112   :  { %1340 = vmatpush1.bf16.msra.mxu0 %v1339_v56  ;;  %754 = vmatprep.mubr.f32.mxu0 %v1432_v7 }
 0x1e0   :  { %v1245_v61 = vpop.f32.mrb[12].mxu0 }
 0x1e1   :  { %v553_v5 = vpop.f32.mrb[13].mxu0 }
 0x1e2   :  { %1141 = vmatmul.mubr.msk.f32.vlgmr.msra.gmra.mrb[12].mxu1 %vm588_vm1, %v553_v5  ;;  %1145 = vmatmul.mubr.msk.f32.vlgmr.msra.gmra.mrb[16].mxu0 %vm588_vm1, %v553_v5 }
 0x1e3   :  { %671 = vmatprep.mubr.f32.mxu1 %v1432_v7  ;;  %760 = vmatprep.mubr.f32.mxu0 %v1432_v7 }
 0x1e4   :  { %v1248_v1 = vpop.f32.mrb[14].mxu0 }
 0x1e5   :  { %v563_v4 = vpop.f32.mrb[15].mxu0 }
 0x1e6   :  { %1142 = vmatmul.mubr.msk.f32.gmra.mrb[14].mxu1 %vm588_vm1, %v1245_v61  ;;  %1146 = vmatmul.mubr.msk.f32.gmra.mrb[18].mxu0 %vm588_vm1, %v1245_v61  ;;  %v255_v61 = vadd.f32 %v1829_v28, %v64_v45 }
 0x1e7   :  { %677 = vmatprep.mubr.f32.mxu1 %v1432_v7  ;;  %766 = vmatprep.mubr.f32.mxu0 %v1432_v7 }
 0x1ea   :  { %1143 = vmatmul.mubr.msk.f32.gmra.mrb[16].mxu1 %vm588_vm1, %v563_v4  ;;  %1147 = vmatmul.mubr.msk.f32.gmra.mrb[20].mxu0 %vm588_vm1, %v563_v4 }
 0x1eb   :  { %683 = vmatprep.mubr.f32.mxu1 %v1432_v7  ;;  %772 = vmatprep.mubr.f32.mxu0 %v1432_v7 }
 0x1ee   :  { %1144 = vmatmul.mubr.msk.f32.gmra.mrb[18].mxu1 %vm588_vm1, %v1248_v1  ;;  %1148 = vmatmul.mubr.msk.f32.gmra.mrb[22].mxu0 %vm588_vm1, %v1248_v1 }
 0x1ef   :  { %915 = vmatprep.mubr.f32.mxu1 %v1432_v7  ;;  %1004 = vmatprep.mubr.f32.mxu0 %v1432_v7 }
 0x2b5   :  { %v667_v9 = vpop.f32.mrb[12].mxu1  ;;  %v756_v12 = vpop.f32.mrb[16].mxu0 }
 0x2b6   :  { %v779_v29 = vsub.f32 %v146_v62, %v667_v9  ;;  %v781_v30 = vsub.f32 %v235_v63, %v756_v12  ;;  %v669_v31 = vpop.f32.mrb[13].mxu1  ;;  %v758_v32 = vpop.f32.mrb[17].mxu0 }
 0x2b7   :  { %v780_v33 = vsub.f32 %v148_v3, %v669_v31  ;;  %v782_v34 = vsub.f32 %v237_v8, %v758_v32 }
 0x2b8   :  { %v795_v19 = vmax.f32 %v779_v29, 0.0  ;;  %v797_v46 = vmax.f32 %v781_v30, 0.0 }
 0x2b9   :  { %v673_v37 = vpop.f32.mrb[14].mxu1  ;;  %v762_v15 = vpop.f32.mrb[18].mxu0  ;;  %v796_v48 = vmax.f32 %v780_v33, 0.0  ;;  %v798_v49 = vmax.f32 %v782_v34, 0.0  ;;  %v811_v33 = vld [vmem:[%s1966_s6] sm:$0xff]  ;;  %v812_v34 = vld [vmem:[%s1966_s6 + $0x8] sm:$0xff] }
 0x2ba   :  { %v783_v38 = vsub.f32 %v152_v35, %v673_v37  ;;  %v785_v39 = vsub.f32 %v241_v36, %v762_v15  ;;  %v675_v40 = vpop.f32.mrb[15].mxu1  ;;  %v764_v41 = vpop.f32.mrb[19].mxu0  ;;  %v813_v35 = vld [vmem:[%s1966_s6 + $0x10] sm:$0xff]  ;;  %v814_v36 = vld [vmem:[%s1966_s6 + $0x18] sm:$0xff]  ;;  %s1434_s6 = smov [#allocation2]  }
 0x2bb   :  { %v784_v44 = vsub.f32 %v154_v13, %v675_v40  ;;  %v786_v17 = vsub.f32 %v243_v14, %v764_v41  ;;  %v822_v13 = vpop.permute.xlu0 %821  ;;  %v827_v40 = vpop.permute.xlu1 %826  ;;  %s1118_s4 = sshll.u32 %s1434_s6, 4  ;;  %s1119_s4 = int_to_ptr.vmem [resolvable:$true] %s1118_s4 }
 0x2bc   :  { %v799_v20 = vmax.f32 %v783_v38, 0.0  ;;  %v801_v47 = vmax.f32 %v785_v39, 0.0  ;;  %s1408_s25 = scalar_lea.vmem %s1119_s4, 1024  ;;  %p1413_p1 = scmp.lt.s32.totalorder %s1119_s4, %s1119_s4 }
 0x2bd   :  { %v800_v23 = vmax.f32 %v784_v44, 0.0  ;;  %v802_v50 = vmax.f32 %v786_v17, 0.0  ;;  %v679_v51 = vpop.f32.mrb[16].mxu1  ;;  %v768_v52 = vpop.f32.mrb[20].mxu0  ;;  %p1409_p0 = scmp.ne.s32.totalorder %s1119_s4, %s1408_s25  ;;  %p1414_p2 = scmp.lt.s32.totalorder %s1408_s25, %s1408_s25 }
 0x2be   :  { %v1343_v53 = vpack.c.bf16 %v799_v20, %v795_v19  ;;  %v1351_v0 = vpack.c.bf16 %v801_v47, %v797_v46  ;;  %v787_v21 = vsub.f32 %v158_v42, %v679_v51  ;;  %v789_v54 = vsub.f32 %v247_v18, %v768_v52  ;;  %v681_v24 = vpop.f32.mrb[17].mxu1  ;;  %v770_v55 = vpop.f32.mrb[21].mxu0 }
 0x2bf   :  { %v1341_v2 = vpack.c.bf16 %v800_v23, %v796_v48  ;;  %v1349_v56 = vpack.c.bf16 %v802_v50, %v798_v49  ;;  %v788_v22 = vsub.f32 %v160_v16, %v681_v24  ;;  %v790_v57 = vsub.f32 %v249_v43, %v770_v55  ;;  %v832_v19 = vpop.permute.xlu0 %831  ;;  %v837_v52 = vpop.permute.xlu1 %836  ;;  %p1415_p3 = por %p1414_p2, %p1413_p1 }
 0x2c0   :  { %v803_v3 = vmax.f32 %v787_v21, 0.0  ;;  %v805_v25 = vmax.f32 %v789_v54, 0.0 }
 0x2c1   :  { %v685_v5 = vpop.f32.mrb[18].mxu1  ;;  %v774_v1 = vpop.f32.mrb[22].mxu0  ;;  %1342 = vmatprep.subr.bf16.mxu1 %v1341_v2  ;;  %1350 = vmatprep.subr.bf16.mxu0 %v1349_v56  ;;  %v804_v9 = vmax.f32 %v788_v22, 0.0  ;;  %v806_v27 = vmax.f32 %v790_v57, 0.0  ;;  %p1416_p4 = pnand %p1415_p3, %p1409_p0 }
 0x2c2   :  { %v791_v4 = vsub.f32 %v164_v58, %v685_v5  ;;  %v793_v6 = vsub.f32 %v253_v59, %v774_v1  ;;  %v687_v10 = vpop.f32.mrb[19].mxu1  ;;  %v776_v11 = vpop.f32.mrb[23].mxu0  ;;  %1344 = vmatpush1.bf16.msra.mxu1 %v1343_v53  ;;  %1352 = vmatpush1.bf16.msra.mxu0 %v1351_v0 }
 0x2c3   :  { %v792_v62 = vsub.f32 %v166_v60, %v687_v10  ;;  %v794_v63 = vsub.f32 %v255_v61, %v776_v11 }
 0x2c4   :  { %v807_v8 = vmax.f32 %v791_v4, 0.0  ;;  %v809_v26 = vmax.f32 %v793_v6, 0.0 }
 0x2c5   :  { %v808_v12 = vmax.f32 %v792_v62, 0.0  ;;  %v810_v28 = vmax.f32 %v794_v63, 0.0 }
 0x2c6   :  { %v1347_v29 = vpack.c.bf16 %v807_v8, %v803_v3  ;;  %v1355_v30 = vpack.c.bf16 %v809_v26, %v805_v25 }
 0x2c7   :  { %v1345_v31 = vpack.c.bf16 %v808_v12, %v804_v9  ;;  %v1353_v32 = vpack.c.bf16 %v810_v28, %v806_v27 }
 0x2c9   :  { %1346 = vmatprep.subr.bf16.mxu1 %v1345_v31  ;;  %1354 = vmatprep.subr.bf16.mxu0 %v1353_v32 }
 0x2ca   :  { %1348 = vmatpush1.bf16.msra.mxu1 %v1347_v29  ;;  %1356 = vmatpush1.bf16.msra.mxu0 %v1355_v30 }
 0x2cb   :  { %1357 = vmatprep.subr.bf16.mxu1 %v1349_v56 }
 0x2cd   :  { %1149 = vmatmul.mubr.msk.f32.vlgmr.msra.gmra.mrb[20].mxu1 %vm588_vm1, %v811_v33  ;;  %1153 = vmatmul.mubr.msk.f32.vlgmr.msra.gmra.mrb[24].mxu0 %vm588_vm1, %v811_v33 }
 0x2ce   :  { %1359 = vmatpush1.bf16.msra.mxu1 %v1351_v0  ;;  %921 = vmatprep.mubr.f32.mxu1 %v1432_v7 }
 0x2cf   :  { %1358 = vmatprep.subr.bf16.mxu1 %v1353_v32  ;;  %1010 = vmatprep.mubr.f32.mxu0 %v1432_v7 }
 0x2d1   :  { %1150 = vmatmul.mubr.msk.f32.gmra.mrb[22].mxu1 %vm588_vm1, %v812_v34  ;;  %1154 = vmatmul.mubr.msk.f32.gmra.mrb[26].mxu0 %vm588_vm1, %v812_v34 }
 0x2d2   :  { %1360 = vmatpush1.bf16.msra.mxu1 %v1355_v30  ;;  %927 = vmatprep.mubr.f32.mxu1 %v1432_v7 }
 0x2d3   :  { %1016 = vmatprep.mubr.f32.mxu0 %v1432_v7 }
 0x2d5   :  { %1151 = vmatmul.mubr.msk.f32.gmra.mrb[24].mxu1 %vm588_vm1, %v813_v35  ;;  %1155 = vmatmul.mubr.msk.f32.gmra.mrb[28].mxu0 %vm588_vm1, %v813_v35 }
 0x2d6   :  { %933 = vmatprep.mubr.f32.mxu1 %v1432_v7 }
 0x2d9   :  { %1152 = vmatmul.mubr.msk.f32.gmra.mrb[26].mxu1 %vm588_vm1, %v814_v36 }
 0x2da   :  { %1022 = vmatprep.mubr.f32.mxu1 %v1432_v7 }
 0x2dd   :  { %1156 = vmatmul.mubr.msk.f32.vlgmr.msra.gmra.mrb[28].mxu1 %vm588_vm1, %v814_v36 }
 0x3a0   :  { %v917_v14 = vpop.f32.mrb[20].mxu1  ;;  %v1006_v37 = vpop.f32.mrb[24].mxu0 }
 0x3a1   :  { %v918_v15 = vadd.f32 %v917_v14, %v822_v13  ;;  %v919_v16 = vpop.f32.mrb[21].mxu1  ;;  %v1008_v38 = vpop.f32.mrb[25].mxu0  ;;  %v1007_v39 = vadd.f32 %v1006_v37, %v822_v13 }
 0x3a2   :  { %v920_v41 = vadd.f32 %v919_v16, %v822_v13  ;;  %v1009_v42 = vadd.f32 %v1008_v38, %v822_v13 }
 0x3a3   :  { %1368 = vtanh.f32 %v918_v15 }
 0x3a4   :  { %v923_v43 = vpop.f32.mrb[22].mxu1  ;;  %v1012_v44 = vpop.f32.mrb[26].mxu0  ;;  %1370 = vtanh.f32 %v1007_v39 }
 0x3a5   :  { %v924_v17 = vadd.f32 %v923_v43, %v827_v40  ;;  %v925_v18 = vpop.f32.mrb[23].mxu1  ;;  %v1014_v45 = vpop.f32.mrb[27].mxu0  ;;  %1372 = vtanh.f32 %v920_v41  ;;  %v1013_v0 = vadd.f32 %v1012_v44, %v827_v40 }
 0x3a6   :  { %v926_v7 = vadd.f32 %v925_v18, %v827_v40  ;;  %1374 = vtanh.f32 %v1009_v42  ;;  %v1015_v24 = vadd.f32 %v1014_v45, %v827_v40 }
 0x3a7   :  { %1376 = vtanh.f32 %v924_v17 }
 0x3a8   :  { %v929_v46 = vpop.f32.mrb[24].mxu1  ;;  %v1018_v20 = vpop.f32.mrb[28].mxu0  ;;  %1378 = vtanh.f32 %v926_v7 }
 0x3a9   :  { %v930_v47 = vadd.f32 %v929_v46, %v832_v19  ;;  %v1019_v48 = vadd.f32 %v1018_v20, %v832_v19  ;;  %v931_v49 = vpop.f32.mrb[25].mxu1  ;;  %v1020_v23 = vpop.f32.mrb[29].mxu0 }
 0x3aa   :  { %v932_v50 = vadd.f32 %v931_v49, %v832_v19  ;;  %v1021_v51 = vadd.f32 %v1020_v23, %v832_v19 }
 0x3ab   :  { %1380 = vtanh.f32 %v930_v47 }
 0x3ac   :  { %1382 = vtanh.f32 %v1019_v48  ;;  %v935_v53 = vpop.f32.mrb[26].mxu1 }
 0x3ad   :  { %1384 = vtanh.f32 %v932_v50  ;;  %v936_v21 = vadd.f32 %v935_v53, %v837_v52  ;;  %v937_v54 = vpop.f32.mrb[27].mxu1  ;;  %v1369_v2 = vpop.eup %1368 }
 0x3ae   :  { %1386 = vtanh.f32 %v1021_v51  ;;  %v938_v55 = vadd.f32 %v937_v54, %v837_v52  ;;  %v1371_v56 = vpop.eup %1370 }
 0x3af   :  { %1388 = vtanh.f32 %v936_v21  ;;  %v1373_v57 = vpop.eup %1372 }
 0x3b0   :  { %1390 = vtanh.f32 %v938_v55  ;;  %v1024_v22 = vpop.f32.mrb[28].mxu1  ;;  %v1375_v60 = vpop.eup %1374 }
 0x3b1   :  { %1392 = vtanh.f32 %v1013_v0  ;;  %v1025_v58 = vadd.f32 %v1024_v22, %v837_v52  ;;  %v1026_v59 = vpop.f32.mrb[29].mxu1  ;;  %v1377_v5 = vpop.eup %1376 }
 0x3b2   :  { %1394 = vtanh.f32 %v1015_v24  ;;  %v1027_v61 = vadd.f32 %v1026_v59, %v837_v52  ;;  %v1379_v1 = vpop.eup %1378 }
 0x3b3   :  { %1396 = vtanh.f32 %v1025_v58 }
 0x3b4   :  { %1398 = vtanh.f32 %v1027_v61 }
 0x3b5   :  { %v1381_v4 = vpop.eup %1380 }
 0x3b6   :  { %v1383_v6 = vpop.eup %1382  ;;  %v1045_v10 = vadd.f32 %v1381_v4, %v1369_v2 }
 0x3b7   :  { %v1385_v11 = vpop.eup %1384  ;;  %v1938_v62 = vadd.f32 %v1383_v6, %v1371_v56 }
 0x3b8   :  { %v1387_v63 = vpop.eup %1386  ;;  %v1046_v3 = vadd.f32 %v1385_v11, %v1373_v57  ;;  %v1053_v29 = vmul.f32 %v1045_v10, %v1045_v10 }
 0x3b9   :  { %v1389_v25 = vpop.eup %1388  ;;  %v1940_v8 = vadd.f32 %v1387_v63, %v1375_v60  ;;  %v1055_v37 = vmul.f32 %v1938_v62, %v1938_v62 }
 0x3ba   :  { %v1391_v26 = vpop.eup %1390  ;;  %v1049_v9 = vadd.f32 %v1389_v25, %v1377_v5  ;;  %v1054_v32 = vmul.f32 %v1046_v3, %v1046_v3 }
 0x3bb   :  { %v1393_v27 = vpop.eup %1392  ;;  %v1050_v12 = vadd.f32 %v1391_v26, %v1379_v1  ;;  %v1056_v38 = vmul.f32 %v1940_v8, %v1940_v8 }
 0x3bc   :  { %v1395_v28 = vpop.eup %1394  ;;  %v1057_v30 = vmul.f32 %v1049_v9, %v1049_v9 }
 0x3bd   :  { %v1397_v31 = vpop.eup %1396  ;;  %v1058_v33 = vmul.f32 %v1050_v12, %v1050_v12 }
 0x3be   :  { %v1399_v34 = vpop.eup %1398  ;;  %v1061_v35 = vadd.f32 %v1057_v30, %v1053_v29  ;;  %v1051_v36 = vadd.f32 %v1397_v31, %v1393_v27 }
 0x3bf   :  { %v1068_v13 = vadd.f32 %v1058_v33, %v1054_v32  ;;  %v1052_v14 = vadd.f32 %v1399_v34, %v1395_v28 }
 0x3c0   :  { %v1062_v15 = vrot.slane %v1061_v35, 4  ;;  %v1059_v16 = vmul.f32 %v1051_v36, %v1051_v36 }
 0x3c1   :  { %v1069_v39 = vrot.slane %v1068_v13, 4  ;;  %v1060_v40 = vmul.f32 %v1052_v14, %v1052_v14 }
 0x3c2   :  { %v1063_v41 = vadd.f32 %v1062_v15, %v1061_v35  ;;  %v1075_v42 = vadd.f32 %v1059_v16, %v1055_v37 }
 0x3c3   :  { %v1070_v43 = vadd.f32 %v1069_v39, %v1068_v13  ;;  %v1082_v44 = vadd.f32 %v1060_v40, %v1056_v38 }
 0x3c4   :  { %v1064_v17 = vrot.slane %v1063_v41, 2  ;;  %v1076_v18 = vrot.slane %v1075_v42, 4 }
 0x3c5   :  { %v1071_v45 = vrot.slane %v1070_v43, 2  ;;  %v1083_v7 = vrot.slane %v1082_v44, 4 }
 0x3c6   :  { %v1065_v19 = vadd.f32 %v1064_v17, %v1063_v41  ;;  %v1077_v46 = vadd.f32 %v1076_v18, %v1075_v42 }
 0x3c7   :  { %v1072_v20 = vadd.f32 %v1071_v45, %v1070_v43  ;;  %v1084_v47 = vadd.f32 %v1083_v7, %v1082_v44 }
 0x3c8   :  { %v1066_v48 = vrot.slane %v1065_v19, 1  ;;  %v1078_v49 = vrot.slane %v1077_v46, 2 }
 0x3c9   :  { %v1073_v23 = vrot.slane %v1072_v20, 1  ;;  %v1085_v50 = vrot.slane %v1084_v47, 2 }
 0x3ca   :  { %v1067_v51 = vadd.f32 %v1066_v48, %v1065_v19  ;;  %v1079_v52 = vadd.f32 %v1078_v49, %v1077_v46 }
 0x3cb   :  { %v1074_v53 = vadd.f32 %v1073_v23, %v1072_v20  ;;  %v1086_v0 = vadd.f32 %v1085_v50, %v1084_v47 }
 0x3cc   :  { %1400 = vrsqrt.f32 %v1067_v51  ;;  %v1080_v21 = vrot.slane %v1079_v52, 1 }
 0x3cd   :  { %1402 = vrsqrt.f32 %v1074_v53  ;;  %v1087_v54 = vrot.slane %v1086_v0, 1 }
 0x3ce   :  { %v1081_v24 = vadd.f32 %v1080_v21, %v1079_v52 }
 0x3cf   :  { %v1088_v55 = vadd.f32 %v1087_v54, %v1086_v0 }
 0x3d0   :  { %1404 = vrsqrt.f32 %v1081_v24 }
 0x3d1   :  { %1406 = vrsqrt.f32 %v1088_v55 }
 0x3d6   :  { %v1401_v2 = vpop.eup %1400 }
 0x3d7   :  { %v1403_v56 = vpop.eup %1402  ;;  %v1097_v22 = vmul.f32 %v1401_v2, %v1045_v10  ;;  %v1101_v57 = vmul.f32 %v1401_v2, %v1049_v9 }
 0x3d8   :  { %v1098_v58 = vmul.f32 %v1403_v56, %v1046_v3  ;;  %v1102_v59 = vmul.f32 %v1403_v56, %v1050_v12 }
 0x3d9   :  { %1105 = vst [vmem:[#allocation2] sm:$0xff] %v1097_v22  ;;  %1109 = vst [vmem:[#allocation2 + $0x20] sm:$0xff] %v1101_v57 }
 0x3da   :  { %v1405_v60 = vpop.eup %1404  ;;  %1106 = vst [vmem:[#allocation2 + $0x8] sm:$0xff] %v1098_v58  ;;  %1110 = vst [vmem:[#allocation2 + $0x28] sm:$0xff] %v1102_v59 }
 0x3db   :  { %v1407_v61 = vpop.eup %1406  ;;  %v1099_v5 = vmul.f32 %v1405_v60, %v1938_v62  ;;  %v1103_v1 = vmul.f32 %v1405_v60, %v1051_v36 }
 0x3dc   :  { %v1100_v4 = vmul.f32 %v1407_v61, %v1940_v8  ;;  %v1104_v6 = vmul.f32 %v1407_v61, %v1052_v14 }
 0x3dd   :  { %1107 = vst [vmem:[#allocation2 + $0x10] sm:$0xff] %v1099_v5  ;;  %1111 = vst [vmem:[#allocation2 + $0x30] sm:$0xff] %v1103_v1 }
 0x3de   :  { %1108 = vst [vmem:[#allocation2 + $0x18] sm:$0xff] %v1100_v4  ;;  %1112 = vst [vmem:[#allocation2 + $0x38] sm:$0xff] %v1104_v6 }
 0x3df   :  { %1419 = shalt.err (!%p1416_p4)
}
 0x3e0   :  { %s1420_s27 = scalar_lea.hbm %s1968_s8, 1024 }
 0x3e1   :  { %p1421_p5 = scmp.ne.s32.totalorder %s1968_s8, %s1420_s27  ;;  %p1424_p6 = scmp.lt.u32.totalorder %s1420_s27, %s1968_s8 }
 0x3e3   :  { %p1426_p7 = pnand %p1424_p6, %p1421_p5 }
 0x3e5   :  { %1429 = shalt.err (!%p1426_p7)
}
 0x3e6   :  { %s1435_s10 = smov 512   ;;  %s1436_s11 = smov 32  }
 0x3e7   :  { %1124 = dma.vmem_to_hbm [thread:$0]  %s1119_s4, 1024, %s1968_s8, [#allocation3], %s1435_s10, %s1435_s10, %s1436_s11  }
 0x3e8   :  { %1430 = dma.done.wait [#allocation3], 1024  }
 0x3e9   :  { %1431 = vsyncadd [#allocation3], 4294966272 }
 0x3ea   :  { %1128 = vsyncpa [#allocation3], 1 }

</bundles_post_ra>
